<compile_context>
chip_gen: v5e
topology: v5e:2x2
jax: 0.10.0
libtpu: 0.0.40
codegen_flags: <defaults>
</compile_context>

<pallas_src>
import numpy as np
import jax
import jax.numpy as jnp
from jax import lax
from jax.experimental import pallas as pl
from jax.experimental.pallas import tpu as pltpu

HEIGHT_WEIGHT = 1.0
CH = 128  # lanes (images) per compute chunk == one f32 vreg width


def _round_up(x, m):
    return ((x + m - 1) // m) * m


def _plane_loss_kernel(feats_ref, out_ref):
    """One grid step == one lane-tile of TB images (all persons).

    feats_ref : (16, P_pad, TB)  rows 0..14 = [j11x..z, j12x..z, j15x..z,
                                               j16x..z, j17x..z], row 15 = mask
    out_ref   : (1, TB)          per-image unbiased std of the plane projection
    """
    tb = feats_ref.shape[-1]
    n_chunks = tb // CH  # static

    def chunk(c, carry):
        c0 = pl.multiple_of(c * CH, CH)
        sl = pl.ds(c0, CH)

        m = feats_ref[15, :, sl]                                   # (P, CH)

        j15x = feats_ref[6, :, sl]
        j15y = feats_ref[7, :, sl]
        j15z = feats_ref[8, :, sl]
        j16x = feats_ref[9, :, sl]
        j16y = feats_ref[10, :, sl]
        j16z = feats_ref[11, :, sl]
        j17x = feats_ref[12, :, sl]
        j17y = feats_ref[13, :, sl]
        j17z = feats_ref[14, :, sl]

        # leg vector: top (joint17) - mean(joint15, joint16)
        dx = j17x - (j15x + j16x) * 0.5
        dy = j17y - (j15y + j16y) * 0.5
        dz = j17z - (j15z + j16z) * 0.5
        sumsq = dx * dx + dy * dy + dz * dz                        # (P, CH)
        # rsqrt on EUP; masked persons get a safe argument and are zeroed by *m.
        inv_len = lax.rsqrt(jnp.where(m > 0.0, sumsq, 1.0)) * m
        lx = dx * inv_len
        ly = dy * inv_len
        lz = dz * inv_len

        # per-image mean leg direction (sum over persons = cross-sublane reduce)
        n = jnp.sum(m, axis=0, keepdims=True)                      # (1, CH)
        inv_n = pl.reciprocal(jnp.maximum(n, 1.0))                 # exact
        nx = jnp.sum(lx, axis=0, keepdims=True) * inv_n
        ny = jnp.sum(ly, axis=0, keepdims=True) * inv_n
        nz = jnp.sum(lz, axis=0, keepdims=True) * inv_n

        # j11/j12 loaded late -> lower peak vreg pressure at large TB.
        j11x = feats_ref[0, :, sl]
        j11y = feats_ref[1, :, sl]
        j11z = feats_ref[2, :, sl]
        j12x = feats_ref[3, :, sl]
        j12y = feats_ref[4, :, sl]
        j12z = feats_ref[5, :, sl]
        rx = (j11x + j12x) * 0.5
        ry = (j11y + j12y) * 0.5
        rz = (j11z + j12z) * 0.5
        proj = rx * nx + ry * ny + rz * nz                         # (P, CH)

        # unbiased std over valid persons of each image (torch.std, ddof=1)
        mean_p = jnp.sum(proj * m, axis=0, keepdims=True) * inv_n
        dev = (proj - mean_p) * m
        inv_nm1 = pl.reciprocal(jnp.maximum(n - 1.0, 1.0))
        var = jnp.sum(dev * dev, axis=0, keepdims=True) * inv_nm1
        dis_std = jnp.where(n > 1.5, jnp.sqrt(var), 0.0)           # 0 if num<=1

        out_ref[:, sl] = dis_std
        return carry

    lax.fori_loop(0, n_chunks, chunk, 0, unroll=True)


def plane_loss(pred_joints, valids):
    """JAX/Pallas equivalent of Plane_Loss.forward. Returns dict."""
    pred_joints = jnp.asarray(pred_joints, jnp.float32)
    valids = jnp.asarray(valids)
    B, P = valids.shape
    N = pred_joints.shape[0]

    # Lane-tile size: big enough to amortize per-step overhead, but keep the
    # grid length >= 2 whenever B allows it so both v7x TensorCores get work.
    B_pad128 = _round_up(B, 128)
    TB = max(128, min(1024, (B_pad128 // 2) // 128 * 128))
    B_pad = _round_up(B, TB)
    P_pad = _round_up(P, 8)

    # --- layout plumbing (wrapper / XLA): one gather + select + transpose ---
    nums = jnp.sum(valids.astype(jnp.int32), axis=1)                # (B,)
    offs = jnp.cumsum(nums) - nums                                  # exclusive
    nums_p = jnp.pad(nums, (0, B_pad - B))                          # (B_pad,)
    offs_p = jnp.pad(offs, (0, B_pad - B))

    p_idx = jnp.arange(P_pad, dtype=jnp.int32)[:, None]             # (P_pad, 1)
    mask = (p_idx < nums_p[None, :]).astype(jnp.float32)            # (P_pad, B_pad)
    rows = jnp.clip(offs_p[None, :] + p_idx, 0, max(N - 1, 0))      # (P_pad, B_pad)

    # Only the 5 joints the loss touches: 11, 12, 15, 16, 17.
    sel = jnp.array([11, 12, 15, 16, 17], dtype=jnp.int32)
    needed = pred_joints[:, sel, :].reshape(N, 15)                  # (N, 15)
    gathered = needed[rows]                                         # (P_pad, B_pad, 15)
    gathered = jnp.where(mask[:, :, None] > 0.0, gathered, 0.0)
    feats = jnp.concatenate(
        [jnp.transpose(gathered, (2, 0, 1)), mask[None]], axis=0)   # (16, P_pad, B_pad)

    grid_spec = pltpu.PrefetchScalarGridSpec(
        num_scalar_prefetch=0,
        grid=(B_pad // TB,),
        in_specs=[pl.BlockSpec((16, P_pad, TB), lambda i: (0, 0, i))],
        out_specs=pl.BlockSpec((1, TB), lambda i: (0, i)),
    )

    per_image_std = pl.pallas_call(
        _plane_loss_kernel,
        out_shape=jax.ShapeDtypeStruct((1, B_pad), jnp.float32),
        grid_spec=grid_spec,
        compiler_params=pltpu.CompilerParams(
            dimension_semantics=("parallel",)),
    )(feats)

    # Padded images have zero mask -> contribute exactly 0.
    loss = jnp.sum(per_image_std) / jnp.float32(B) * jnp.float32(HEIGHT_WEIGHT)
    return {"plane_loss": loss}


def _reference_plane_loss(pred_joints, valids):
    """Pure NumPy mirror of the PyTorch module (for verification)."""
    pred_joints = np.asarray(pred_joints, dtype=np.float32)
    valids = np.asarray(valids).astype(np.int8)
    B = valids.shape[0]
    idx = 0
    loss = 0.0
    for img in valids:
        num = int(img.sum())
        if num <= 1:
            dis_std = 0.0
        else:
            joints = pred_joints[idx:idx + num]
            bottom = (joints[:, 15] + joints[:, 16]) / 2.0
            top = joints[:, 17]
            l = (top - bottom) / np.linalg.norm(top - bottom, axis=1)[:, None]
            norm = l.mean(axis=0)
            root = (joints[:, 11] + joints[:, 12]) / 2.0
            proj = root @ norm
            dis_std = float(np.std(proj, ddof=1))
        idx += num
        loss += dis_std
    return loss / B * HEIGHT_WEIGHT


if __name__ == "__main__":
    key = jax.random.PRNGKey(0)

    B, P, J = 4, 6, 19  # batch of 4 images, up to 6 persons each, 19 joints
    valids = jnp.array(
        [[1, 1, 1, 0, 0, 0],
         [1, 0, 0, 0, 0, 0],      # num <= 1 branch
         [1, 1, 1, 1, 1, 0],
         [0, 0, 0, 0, 0, 0]],     # num == 0 branch
        dtype=jnp.float32,
    )
    N = int(np.asarray(valids).sum())  # total packed persons = 9
    pred_joints = jax.random.normal(key, (N, J, 3), dtype=jnp.float32)

    out = plane_loss(pred_joints, valids)
    jax.block_until_ready(out["plane_loss"])

    ref = _reference_plane_loss(np.asarray(pred_joints), np.asarray(valids))
    np.testing.assert_allclose(float(out["plane_loss"]), ref, rtol=1e-3, atol=1e-4)

    print("KERNEL_OK")
</pallas_src>

<mosaic_0001>
module attributes {stable_mosaic.version = 11 : i64} {
  func.func @_plane_loss_kernel(%arg0: i32, %arg1: memref<16x8x128xf32, #tpu.memory_space<vmem>>, %arg2: memref<1x128xf32, #tpu.memory_space<vmem>>) attributes {dimension_semantics = [#tpu.dimension_semantics<parallel>], iteration_bounds = array<i64: 1>, scalar_prefetch = 0 : i64, scratch_operands = 0 : i64, tpu.core_type = #tpu.core_type<tc>, window_params = [{transform_indices = @transform_0, window_bounds = array<i64: 16, 8, 128>}, {transform_indices = @transform_1, window_bounds = array<i64: 1, 128>}]} {
    %c0_i32 = arith.constant 0 : i32
    %c128_i32 = arith.constant 128 : i32
    %0 = arith.muli %c0_i32, %c128_i32 : i32
    %1 = tpu.assume_multiple %0, 128 : i32
    %c15 = arith.constant 15 : index
    %c0 = arith.constant 0 : index
    %2 = arith.index_cast %1 : i32 to index
    %3 = vector.load %arg1[%c15, %c0, %2] : memref<16x8x128xf32, #tpu.memory_space<vmem>>, vector<1x8x128xf32>
    %4 = vector.shape_cast %3 : vector<1x8x128xf32> to vector<8x128xf32>
    %c6 = arith.constant 6 : index
    %c0_0 = arith.constant 0 : index
    %5 = arith.index_cast %1 : i32 to index
    %6 = vector.load %arg1[%c6, %c0_0, %5] : memref<16x8x128xf32, #tpu.memory_space<vmem>>, vector<1x8x128xf32>
    %7 = vector.shape_cast %6 : vector<1x8x128xf32> to vector<8x128xf32>
    %c7 = arith.constant 7 : index
    %c0_1 = arith.constant 0 : index
    %8 = arith.index_cast %1 : i32 to index
    %9 = vector.load %arg1[%c7, %c0_1, %8] : memref<16x8x128xf32, #tpu.memory_space<vmem>>, vector<1x8x128xf32>
    %10 = vector.shape_cast %9 : vector<1x8x128xf32> to vector<8x128xf32>
    %c8 = arith.constant 8 : index
    %c0_2 = arith.constant 0 : index
    %11 = arith.index_cast %1 : i32 to index
    %12 = vector.load %arg1[%c8, %c0_2, %11] : memref<16x8x128xf32, #tpu.memory_space<vmem>>, vector<1x8x128xf32>
    %13 = vector.shape_cast %12 : vector<1x8x128xf32> to vector<8x128xf32>
    %c9 = arith.constant 9 : index
    %c0_3 = arith.constant 0 : index
    %14 = arith.index_cast %1 : i32 to index
    %15 = vector.load %arg1[%c9, %c0_3, %14] : memref<16x8x128xf32, #tpu.memory_space<vmem>>, vector<1x8x128xf32>
    %16 = vector.shape_cast %15 : vector<1x8x128xf32> to vector<8x128xf32>
    %c10 = arith.constant 10 : index
    %c0_4 = arith.constant 0 : index
    %17 = arith.index_cast %1 : i32 to index
    %18 = vector.load %arg1[%c10, %c0_4, %17] : memref<16x8x128xf32, #tpu.memory_space<vmem>>, vector<1x8x128xf32>
    %19 = vector.shape_cast %18 : vector<1x8x128xf32> to vector<8x128xf32>
    %c11 = arith.constant 11 : index
    %c0_5 = arith.constant 0 : index
    %20 = arith.index_cast %1 : i32 to index
    %21 = vector.load %arg1[%c11, %c0_5, %20] : memref<16x8x128xf32, #tpu.memory_space<vmem>>, vector<1x8x128xf32>
    %22 = vector.shape_cast %21 : vector<1x8x128xf32> to vector<8x128xf32>
    %c12 = arith.constant 12 : index
    %c0_6 = arith.constant 0 : index
    %23 = arith.index_cast %1 : i32 to index
    %24 = vector.load %arg1[%c12, %c0_6, %23] : memref<16x8x128xf32, #tpu.memory_space<vmem>>, vector<1x8x128xf32>
    %25 = vector.shape_cast %24 : vector<1x8x128xf32> to vector<8x128xf32>
    %c13 = arith.constant 13 : index
    %c0_7 = arith.constant 0 : index
    %26 = arith.index_cast %1 : i32 to index
    %27 = vector.load %arg1[%c13, %c0_7, %26] : memref<16x8x128xf32, #tpu.memory_space<vmem>>, vector<1x8x128xf32>
    %28 = vector.shape_cast %27 : vector<1x8x128xf32> to vector<8x128xf32>
    %c14 = arith.constant 14 : index
    %c0_8 = arith.constant 0 : index
    %29 = arith.index_cast %1 : i32 to index
    %30 = vector.load %arg1[%c14, %c0_8, %29] : memref<16x8x128xf32, #tpu.memory_space<vmem>>, vector<1x8x128xf32>
    %31 = vector.shape_cast %30 : vector<1x8x128xf32> to vector<8x128xf32>
    %32 = arith.addf %7, %16 : vector<8x128xf32>
    %cst = arith.constant 5.000000e-01 : f32
    %33 = vector.broadcast %cst : f32 to vector<8x128xf32>
    %34 = arith.mulf %32, %33 : vector<8x128xf32>
    %35 = arith.subf %25, %34 : vector<8x128xf32>
    %36 = arith.addf %10, %19 : vector<8x128xf32>
    %cst_9 = arith.constant 5.000000e-01 : f32
    %37 = vector.broadcast %cst_9 : f32 to vector<8x128xf32>
    %38 = arith.mulf %36, %37 : vector<8x128xf32>
    %39 = arith.subf %28, %38 : vector<8x128xf32>
    %40 = arith.addf %13, %22 : vector<8x128xf32>
    %cst_10 = arith.constant 5.000000e-01 : f32
    %41 = vector.broadcast %cst_10 : f32 to vector<8x128xf32>
    %42 = arith.mulf %40, %41 : vector<8x128xf32>
    %43 = arith.subf %31, %42 : vector<8x128xf32>
    %44 = arith.mulf %35, %35 : vector<8x128xf32>
    %45 = arith.mulf %39, %39 : vector<8x128xf32>
    %46 = arith.addf %44, %45 : vector<8x128xf32>
    %47 = arith.mulf %43, %43 : vector<8x128xf32>
    %48 = arith.addf %46, %47 : vector<8x128xf32>
    %cst_11 = arith.constant 0.000000e+00 : f32
    %49 = vector.broadcast %cst_11 : f32 to vector<8x128xf32>
    %50 = arith.cmpf ogt, %4, %49 : vector<8x128xf32>
    %cst_12 = arith.constant 1.000000e+00 : f32
    %51 = vector.broadcast %cst_12 : f32 to vector<8x128xf32>
    %52 = arith.select %50, %48, %51 : vector<8x128xi1>, vector<8x128xf32>
    %53 = math.rsqrt %52 : vector<8x128xf32>
    %54 = arith.mulf %53, %4 : vector<8x128xf32>
    %55 = arith.mulf %35, %54 : vector<8x128xf32>
    %56 = arith.mulf %39, %54 : vector<8x128xf32>
    %57 = arith.mulf %43, %54 : vector<8x128xf32>
    %cst_13 = arith.constant dense<0.000000e+00> : vector<128xf32>
    %58 = vector.multi_reduction <add>, %4, %cst_13 [0] : vector<8x128xf32> to vector<128xf32>
    %59 = vector.shape_cast %58 : vector<128xf32> to vector<1x128xf32>
    %cst_14 = arith.constant 1.000000e+00 : f32
    %60 = vector.broadcast %cst_14 : f32 to vector<1x128xf32>
    %61 = arith.maximumf %59, %60 : vector<1x128xf32>
    %62 = tpu.reciprocal %61 : vector<1x128xf32> -> vector<1x128xf32>
    %cst_15 = arith.constant dense<0.000000e+00> : vector<128xf32>
    %63 = vector.multi_reduction <add>, %55, %cst_15 [0] : vector<8x128xf32> to vector<128xf32>
    %64 = vector.shape_cast %63 : vector<128xf32> to vector<1x128xf32>
    %65 = arith.mulf %64, %62 : vector<1x128xf32>
    %cst_16 = arith.constant dense<0.000000e+00> : vector<128xf32>
    %66 = vector.multi_reduction <add>, %56, %cst_16 [0] : vector<8x128xf32> to vector<128xf32>
    %67 = vector.shape_cast %66 : vector<128xf32> to vector<1x128xf32>
    %68 = arith.mulf %67, %62 : vector<1x128xf32>
    %cst_17 = arith.constant dense<0.000000e+00> : vector<128xf32>
    %69 = vector.multi_reduction <add>, %57, %cst_17 [0] : vector<8x128xf32> to vector<128xf32>
    %70 = vector.shape_cast %69 : vector<128xf32> to vector<1x128xf32>
    %71 = arith.mulf %70, %62 : vector<1x128xf32>
    %c0_18 = arith.constant 0 : index
    %c0_19 = arith.constant 0 : index
    %72 = arith.index_cast %1 : i32 to index
    %73 = vector.load %arg1[%c0_18, %c0_19, %72] : memref<16x8x128xf32, #tpu.memory_space<vmem>>, vector<1x8x128xf32>
    %74 = vector.shape_cast %73 : vector<1x8x128xf32> to vector<8x128xf32>
    %c1 = arith.constant 1 : index
    %c0_20 = arith.constant 0 : index
    %75 = arith.index_cast %1 : i32 to index
    %76 = vector.load %arg1[%c1, %c0_20, %75] : memref<16x8x128xf32, #tpu.memory_space<vmem>>, vector<1x8x128xf32>
    %77 = vector.shape_cast %76 : vector<1x8x128xf32> to vector<8x128xf32>
    %c2 = arith.constant 2 : index
    %c0_21 = arith.constant 0 : index
    %78 = arith.index_cast %1 : i32 to index
    %79 = vector.load %arg1[%c2, %c0_21, %78] : memref<16x8x128xf32, #tpu.memory_space<vmem>>, vector<1x8x128xf32>
    %80 = vector.shape_cast %79 : vector<1x8x128xf32> to vector<8x128xf32>
    %c3 = arith.constant 3 : index
    %c0_22 = arith.constant 0 : index
    %81 = arith.index_cast %1 : i32 to index
    %82 = vector.load %arg1[%c3, %c0_22, %81] : memref<16x8x128xf32, #tpu.memory_space<vmem>>, vector<1x8x128xf32>
    %83 = vector.shape_cast %82 : vector<1x8x128xf32> to vector<8x128xf32>
    %c4 = arith.constant 4 : index
    %c0_23 = arith.constant 0 : index
    %84 = arith.index_cast %1 : i32 to index
    %85 = vector.load %arg1[%c4, %c0_23, %84] : memref<16x8x128xf32, #tpu.memory_space<vmem>>, vector<1x8x128xf32>
    %86 = vector.shape_cast %85 : vector<1x8x128xf32> to vector<8x128xf32>
    %c5 = arith.constant 5 : index
    %c0_24 = arith.constant 0 : index
    %87 = arith.index_cast %1 : i32 to index
    %88 = vector.load %arg1[%c5, %c0_24, %87] : memref<16x8x128xf32, #tpu.memory_space<vmem>>, vector<1x8x128xf32>
    %89 = vector.shape_cast %88 : vector<1x8x128xf32> to vector<8x128xf32>
    %90 = arith.addf %74, %83 : vector<8x128xf32>
    %cst_25 = arith.constant 5.000000e-01 : f32
    %91 = vector.broadcast %cst_25 : f32 to vector<8x128xf32>
    %92 = arith.mulf %90, %91 : vector<8x128xf32>
    %93 = arith.addf %77, %86 : vector<8x128xf32>
    %cst_26 = arith.constant 5.000000e-01 : f32
    %94 = vector.broadcast %cst_26 : f32 to vector<8x128xf32>
    %95 = arith.mulf %93, %94 : vector<8x128xf32>
    %96 = arith.addf %80, %89 : vector<8x128xf32>
    %cst_27 = arith.constant 5.000000e-01 : f32
    %97 = vector.broadcast %cst_27 : f32 to vector<8x128xf32>
    %98 = arith.mulf %96, %97 : vector<8x128xf32>
    %99 = vector.broadcast %65 : vector<1x128xf32> to vector<8x128xf32>
    %100 = arith.mulf %92, %99 : vector<8x128xf32>
    %101 = vector.broadcast %68 : vector<1x128xf32> to vector<8x128xf32>
    %102 = arith.mulf %95, %101 : vector<8x128xf32>
    %103 = arith.addf %100, %102 : vector<8x128xf32>
    %104 = vector.broadcast %71 : vector<1x128xf32> to vector<8x128xf32>
    %105 = arith.mulf %98, %104 : vector<8x128xf32>
    %106 = arith.addf %103, %105 : vector<8x128xf32>
    %107 = arith.mulf %106, %4 : vector<8x128xf32>
    %cst_28 = arith.constant dense<0.000000e+00> : vector<128xf32>
    %108 = vector.multi_reduction <add>, %107, %cst_28 [0] : vector<8x128xf32> to vector<128xf32>
    %109 = vector.shape_cast %108 : vector<128xf32> to vector<1x128xf32>
    %110 = arith.mulf %109, %62 : vector<1x128xf32>
    %111 = vector.broadcast %110 : vector<1x128xf32> to vector<8x128xf32>
    %112 = arith.subf %106, %111 : vector<8x128xf32>
    %113 = arith.mulf %112, %4 : vector<8x128xf32>
    %cst_29 = arith.constant 1.000000e+00 : f32
    %114 = vector.broadcast %cst_29 : f32 to vector<1x128xf32>
    %115 = arith.subf %59, %114 : vector<1x128xf32>
    %cst_30 = arith.constant 1.000000e+00 : f32
    %116 = vector.broadcast %cst_30 : f32 to vector<1x128xf32>
    %117 = arith.maximumf %115, %116 : vector<1x128xf32>
    %118 = tpu.reciprocal %117 : vector<1x128xf32> -> vector<1x128xf32>
    %119 = arith.mulf %113, %113 : vector<8x128xf32>
    %cst_31 = arith.constant dense<0.000000e+00> : vector<128xf32>
    %120 = vector.multi_reduction <add>, %119, %cst_31 [0] : vector<8x128xf32> to vector<128xf32>
    %121 = vector.shape_cast %120 : vector<128xf32> to vector<1x128xf32>
    %122 = arith.mulf %121, %118 : vector<1x128xf32>
    %cst_32 = arith.constant 1.500000e+00 : f32
    %123 = vector.broadcast %cst_32 : f32 to vector<1x128xf32>
    %124 = arith.cmpf ogt, %59, %123 : vector<1x128xf32>
    %125 = math.sqrt %122 : vector<1x128xf32>
    %cst_33 = arith.constant 0.000000e+00 : f32
    %126 = vector.broadcast %cst_33 : f32 to vector<1x128xf32>
    %127 = arith.select %124, %125, %126 : vector<1x128xi1>, vector<1x128xf32>
    %c0_34 = arith.constant 0 : index
    %128 = arith.index_cast %1 : i32 to index
    %129 = vector.load %arg2[%c0_34, %128] : memref<1x128xf32, #tpu.memory_space<vmem>>, vector<1x128xf32>
    tpu.vector_store %arg2[%c0_34, %128], %127 {strides = array<i32>} : memref<1x128xf32, #tpu.memory_space<vmem>>, vector<1x128xf32>,
    %c1_i32 = arith.constant 1 : i32
    return
  }
  func.func @transform_0(%arg0: i32) -> (i32, i32, i32) {
    %c0_i32 = arith.constant 0 : i32
    %c0_i32_0 = arith.constant 0 : i32
    %c0_i32_1 = arith.constant 0 : i32
    return %c0_i32, %c0_i32_0, %arg0 : i32, i32, i32
  }
  func.func @transform_1(%arg0: i32) -> (i32, i32) {
    %c0_i32 = arith.constant 0 : i32
    %c0_i32_0 = arith.constant 0 : i32
    return %c0_i32, %arg0 : i32, i32
  }
}

</mosaic_0001>

<bundles_post_ra>
// kernel: tpu_custom_call.1
= control target key start
LH: loop header
LB: loop body
LE: loop exit
PB: predicated region body
PF: predicated region fallthrough
CT: control target
= control target key end

     0   :  { %6 = vsyncpa [#allocation3], 0  ;;  %s341_s0 = inlined_call_operand.hbm [shape: f32[16,8,128], index: 0, kind: input, shape index: {}]   ;;  %s342_s1 = inlined_call_operand.hbm [shape: f32[1,128], index: 1, kind: output, shape index: {}]  }
   0x1   :  { %7 = vsyncpa [#allocation4], 0  ;;  %s12_s8 = sshll.u32 %s341_s0, 4  ;;  %s300_s9 = smov [#allocation2]   ;;  %s13_s8 = int_to_ptr.hbm [resolvable:$true] %s12_s8 }
   0x2   :  { %s14_s10 = sshll.u32 %s300_s9, 4  ;;  %s301_s11 = smov 128   ;;  %s15_s10 = int_to_ptr.vmem [resolvable:$true] %s14_s10 }
   0x3   :  { %s302_s12 = smov 8  }
   0x4   :  { %20 = dma.hbm_to_vmem [thread:$0]  %s13_s8, 2048, %s15_s10, [#allocation3], %s301_s11, %s301_s11, %s302_s12  }
   0x5   :  { %296 = dma.done.wait [#allocation3], 2048  }
   0x6   :  { %297 = vsyncadd [#allocation3], 4294965248  ;;  %v317_v0 = vld [vmem:[#allocation2 + $0x78] sm:$0xff]  ;;  %v30_v1 = vld [vmem:[#allocation2 + $0x30] sm:$0xff]  ;;  %s303_s0 = smov [#allocation5]   ;;  %s210_s16 = sshll.u32 %s342_s1, 4  ;;  %s211_s16 = int_to_ptr.hbm [resolvable:$true] %s210_s16 }
   0x7   :  { %v33_v2 = vld [vmem:[#allocation2 + $0x38] sm:$0xff]  ;;  %v36_v3 = vld [vmem:[#allocation2 + $0x40] sm:$0xff]  ;;  %v39_v4 = vld [vmem:[#allocation2 + $0x48] sm:$0xff]  ;;  %v85_v6 = vrot.slane %v317_v0, 4  ;;  %vm69_vm0 = vcmp.gt.f32.partialorder %v317_v0, 0.0  ;;  %s208_s13 = sshll.u32 %s303_s0, 4  ;;  %s209_s13 = int_to_ptr.vmem [resolvable:$true] %s208_s13 }
   0x8   :  { %v42_v5 = vld [vmem:[#allocation2 + $0x50] sm:$0xff]  ;;  %v45_v7 = vld [vmem:[#allocation2 + $0x58] sm:$0xff]  ;;  %v55_v8 = vadd.f32 %v39_v4, %v30_v1  ;;  %v48_v10 = vld [vmem:[#allocation2 + $0x60] sm:$0xff] }
   0x9   :  { %v58_v9 = vadd.f32 %v42_v5, %v33_v2  ;;  %v51_v11 = vld [vmem:[#allocation2 + $0x68] sm:$0xff]  ;;  %v61_v12 = vadd.f32 %v45_v7, %v36_v3  ;;  %v86_v13 = vadd.f32 %v85_v6, %v317_v0  ;;  %v54_v14 = vld [vmem:[#allocation2 + $0x70] sm:$0xff]  ;;  %v127_v52 = vld [vmem:[#allocation2] sm:$0xff] }
   0xa   :  { %v56_v15 = vmul.f32 0.5, %v55_v8  ;;  %v130_v53 = vld [vmem:[#allocation2 + $0x8] sm:$0xff]  ;;  %v136_v54 = vld [vmem:[#allocation2 + $0x18] sm:$0xff]  ;;  %v133_v59 = vld [vmem:[#allocation2 + $0x10] sm:$0xff] }
   0xb   :  { %v59_v16 = vmul.f32 0.5, %v58_v9  ;;  %v62_v17 = vmul.f32 0.5, %v61_v12  ;;  %v87_v18 = vrot.slane %v86_v13, 2  ;;  %v139_v60 = vld [vmem:[#allocation2 + $0x20] sm:$0xff]  ;;  %v142_v61 = vld [vmem:[#allocation2 + $0x28] sm:$0xff]  ;;  %v143_v3 = vadd.f32 %v136_v54, %v127_v52 }
   0xc   :  { %v57_v19 = vsub.f32 %v48_v10, %v56_v15  ;;  %v145_v5 = vadd.f32 %v139_v60, %v130_v53  ;;  %v147_v6 = vadd.f32 %v142_v61, %v133_v59 }
   0xd   :  { %v60_v20 = vsub.f32 %v51_v11, %v59_v16  ;;  %v63_v21 = vsub.f32 %v54_v14, %v62_v17  ;;  %v88_v22 = vadd.f32 %v87_v18, %v86_v13  ;;  %v144_v15 = vmul.f32 0.5, %v143_v3 }
   0xe   :  { %v64_v23 = vmul.f32 %v57_v19, %v57_v19  ;;  %v146_v16 = vmul.f32 0.5, %v145_v5 }
   0xf   :  { %v65_v24 = vmul.f32 %v60_v20, %v60_v20  ;;  %v67_v25 = vmul.f32 %v63_v21, %v63_v21  ;;  %v89_v26 = vrot.slane %v88_v22, 1 }
  0x11   :  { %v66_v27 = vadd.f32 %v65_v24, %v64_v23  ;;  %v322_v28 = vadd.f32 %v89_v26, %v88_v22 }
  0x13   :  { %v68_v29 = vadd.f32 %v67_v25, %v66_v27  ;;  %v91_v31 = vmax.f32 %v322_v28, 1.0  ;;  %v235_v27 = vadd.f32 -1.0, %v322_v28  ;;  %vm188_vm14 = vcmp.gt.f32.partialorder %v322_v28, 1.5 }
  0x15   :  { %v70_v30 = vsel %vm69_vm0, %v68_v29, 1.0  ;;  %vm97_vm4 = vweird.f32 %v91_v31  ;;  %v101_v50 = vand.u32 2147483647, %v91_v31  ;;  %v103_v51 = vand.u32 2147483648, %v91_v31 }
  0x16   :  { %240 = vrsqrt.f32 %v70_v30  ;;  %vm77_vm1 = vweird.f32 %v70_v30 }
  0x17   :  { %242 = vrcp.f32 %v91_v31  ;;  %vm102_vm7 = vcmp.eq.f32.partialorder %v101_v50, 8.507059e+37  ;;  %v104_v4 = vor.u32 1.1754944e-38, %v103_v51 }
  0x1c   :  { %v241_v32 = vpop.eup %240 }
  0x1d   :  { %v72_v33 = vmul.f32 %v241_v32, %v70_v30  ;;  %v243_v34 = vpop.eup %242  ;;  %vm78_vm2 = vweird.f32 %v241_v32 }
  0x1e   :  { %v93_v37 = vmul.f32 %v243_v34, %v91_v31  ;;  %vm79_vm3 = vmor %vm77_vm1, %vm78_vm2  ;;  %vm98_vm5 = vweird.f32 %v243_v34  ;;  %v165_v31 = vmax.f32 %v235_v27, 1.0 }
  0x1f   :  { %v73_v35 = vmul.f32 %v241_v32, %v72_v33  ;;  %vm328_vm6 = vmor %vm97_vm4, %vm98_vm5 }
  0x20   :  { %v94_v40 = vsub.f32 1.0, %v93_v37  ;;  %244 = vrcp.f32 %v165_v31  ;;  %vm171_vm8 = vweird.f32 %v165_v31  ;;  %v175_v50 = vand.u32 2147483647, %v165_v31 }
  0x21   :  { %v74_v36 = vmul.f32 0.5, %v73_v35 }
  0x22   :  { %v95_v46 = vmul.f32 %v243_v34, %v94_v40  ;;  %vm176_vm11 = vcmp.eq.f32.partialorder %v175_v50, 8.507059e+37 }
  0x23   :  { %v75_v38 = vsub.f32 1.5, %v74_v36 }
  0x24   :  { %v96_v55 = vadd.f32 %v243_v34, %v95_v46 }
  0x25   :  { %v76_v39 = vmul.f32 %v241_v32, %v75_v38 }
  0x26   :  { %v100_v7 = vsel %vm328_vm6, %v243_v34, %v96_v55  ;;  %v245_v37 = vpop.eup %244 }
  0x27   :  { %v80_v41 = vsel %vm79_vm3, %v241_v32, %v76_v39  ;;  %v105_v14 = vsel %vm102_vm7, %v104_v4, %v100_v7  ;;  %v167_v40 = vmul.f32 %v245_v37, %v165_v31  ;;  %vm172_vm9 = vweird.f32 %v245_v37 }
  0x28   :  { %v81_v42 = vmul.f32 %v80_v41, %v317_v0  ;;  %vm173_vm10 = vmor %vm171_vm8, %vm172_vm9 }
  0x2a   :  { %v82_v43 = vmul.f32 %v81_v42, %v57_v19  ;;  %v83_v44 = vmul.f32 %v81_v42, %v60_v20  ;;  %v84_v45 = vmul.f32 %v81_v42, %v63_v21  ;;  %v148_v20 = vmul.f32 0.5, %v147_v6 }
  0x2c   :  { %v106_v47 = vrot.slane %v82_v43, 4  ;;  %v113_v48 = vrot.slane %v83_v44, 4  ;;  %v120_v49 = vrot.slane %v84_v45, 4 }
  0x2e   :  { %v107_v56 = vadd.f32 %v106_v47, %v82_v43  ;;  %v114_v57 = vadd.f32 %v113_v48, %v83_v44  ;;  %v121_v58 = vadd.f32 %v120_v49, %v84_v45  ;;  %v168_v43 = vsub.f32 1.0, %v167_v40 }
  0x2f   :  { %v177_v48 = vand.u32 2147483648, %v165_v31 }
  0x30   :  { %v108_v63 = vrot.slane %v107_v56, 2  ;;  %v115_v1 = vrot.slane %v114_v57, 2  ;;  %v122_v2 = vrot.slane %v121_v58, 2  ;;  %v169_v45 = vmul.f32 %v245_v37, %v168_v43 }
  0x31   :  { %v178_v53 = vor.u32 1.1754944e-38, %v177_v48 }
  0x32   :  { %v109_v8 = vadd.f32 %v108_v63, %v107_v56  ;;  %v116_v9 = vadd.f32 %v115_v1, %v114_v57  ;;  %v123_v10 = vadd.f32 %v122_v2, %v121_v58  ;;  %v170_v49 = vadd.f32 %v245_v37, %v169_v45 }
  0x34   :  { %v110_v11 = vrot.slane %v109_v8, 1  ;;  %v117_v12 = vrot.slane %v116_v9, 1  ;;  %v124_v13 = vrot.slane %v123_v10, 1  ;;  %v174_v54 = vsel %vm173_vm10, %v245_v37, %v170_v49 }
  0x35   :  { %v179_v57 = vsel %vm176_vm11, %v178_v53, %v174_v54 }
  0x36   :  { %v111_v17 = vadd.f32 %v110_v11, %v109_v8  ;;  %v118_v18 = vadd.f32 %v117_v12, %v116_v9  ;;  %v125_v19 = vadd.f32 %v124_v13, %v123_v10 }
  0x38   :  { %v112_v21 = vmul.f32 %v111_v17, %v105_v14  ;;  %v119_v22 = vmul.f32 %v118_v18, %v105_v14  ;;  %v126_v23 = vmul.f32 %v125_v19, %v105_v14 }
  0x3a   :  { %v149_v24 = vmul.f32 %v144_v15, %v112_v21  ;;  %v150_v25 = vmul.f32 %v146_v16, %v119_v22  ;;  %v152_v26 = vmul.f32 %v148_v20, %v126_v23 }
  0x3c   :  { %v151_v29 = vadd.f32 %v150_v25, %v149_v24 }
  0x3e   :  { %v153_v30 = vadd.f32 %v152_v26, %v151_v29 }
  0x40   :  { %v154_v32 = vmul.f32 %v153_v30, %v317_v0 }
  0x42   :  { %v155_v33 = vrot.slane %v154_v32, 4 }
  0x44   :  { %v156_v34 = vadd.f32 %v155_v33, %v154_v32 }
  0x46   :  { %v157_v35 = vrot.slane %v156_v34, 2 }
  0x48   :  { %v158_v36 = vadd.f32 %v157_v35, %v156_v34 }
  0x4a   :  { %v159_v38 = vrot.slane %v158_v36, 1 }
  0x4c   :  { %v160_v39 = vadd.f32 %v159_v38, %v158_v36 }
  0x4e   :  { %v161_v41 = vmul.f32 %v160_v39, %v105_v14 }
  0x50   :  { %v162_v42 = vsub.f32 %v153_v30, %v161_v41 }
  0x52   :  { %v163_v44 = vmul.f32 %v162_v42, %v317_v0 }
  0x54   :  { %v180_v46 = vmul.f32 %v163_v44, %v163_v44 }
  0x56   :  { %v181_v47 = vrot.slane %v180_v46, 4 }
  0x58   :  { %v182_v51 = vadd.f32 %v181_v47, %v180_v46 }
  0x5a   :  { %v183_v52 = vrot.slane %v182_v51, 2 }
  0x5c   :  { %v184_v55 = vadd.f32 %v183_v52, %v182_v51 }
  0x5e   :  { %v185_v56 = vrot.slane %v184_v55, 1 }
  0x60   :  { %v186_v58 = vadd.f32 %v185_v56, %v184_v55 }
  0x62   :  { %v187_v59 = vmul.f32 %v186_v58, %v179_v57 }
  0x64   :  { %246 = vrsqrt.f32 %v187_v59  ;;  %vm196_vm12 = vcmp.eq.f32.partialorder %v187_v59, inf  ;;  %v199_v2 = vand.u32 2147483648, %v187_v59  ;;  %vm198_vm13 = vcmp.eq.f32.partialorder %v187_v59, 0.0 }
  0x6a   :  { %v247_v0 = vpop.eup %246 }
  0x6b   :  { %v190_v60 = vmul.f32 %v247_v0, %v187_v59 }
  0x6d   :  { %v191_v61 = vmul.f32 %v247_v0, %v190_v60 }
  0x6f   :  { %v192_v62 = vmul.f32 0.5, %v191_v61 }
  0x71   :  { %v193_v63 = vsub.f32 1.5, %v192_v62 }
  0x73   :  { %v194_v1 = vmul.f32 %v247_v0, %v193_v63 }
  0x75   :  { %v195_v3 = vmul.f32 %v194_v1, %v187_v59 }
  0x77   :  { %v197_v4 = vsel %vm196_vm12, %v187_v59, %v195_v3 }
  0x78   :  { %v200_v5 = vsel %vm198_vm13, %v199_v2, %v197_v4 }
  0x79   :  { %v201_v6 = vsel %vm188_vm14, %v200_v5, 0.0 }
  0x7a   :  { %202 = vst [vmem:[#allocation5] sm:$0x1] %v201_v6 }
  0x7b   :  { %213 = dma.vmem_to_hbm [thread:$0]  %s209_s13, 16, %s211_s16, [#allocation4]  }
  0x7c   :  { %298 = dma.done.wait [#allocation4], 16  }
  0x7d   :  { %299 = vsyncadd [#allocation4], 4294967280 }
  0x7e   :  { %218 = vsyncpa [#allocation3], 1 }
  0x7f   :  { %219 = vsyncpa [#allocation4], 1 }

</bundles_post_ra>
